<compile_context>
chip_gen: v5e
topology: v5e:2x2
jax: 0.10.0
libtpu: 0.0.40
codegen_flags: <defaults>
</compile_context>

<pallas_src>
import functools

import jax
import jax.numpy as jnp
from jax.experimental import pallas as pl
from jax.experimental.pallas import tpu as pltpu


def cmd_kernel(x1_ref, x2_ref, sq_ref, *, n_moments: int, n_rows: int, row_chunk: int):
    """One D-tile: per-moment, lane-folded squared differences of central-moment means.

    sq_ref[m, :] (shape (128,)) holds the partial sum over this tile's features of
    (mean-moment diff)^2 for moment index m (m == 0 is the raw-mean moment).
    """
    t = x1_ref.shape[1]                       # TILE_D, multiple of 128
    inv_n = jnp.float32(1.0 / n_rows)

    # ---- pass 1: per-feature sums, streamed over row chunks (no (N,T) temporaries) ----
    s1 = jnp.zeros((1, t), jnp.float32)
    s2 = jnp.zeros((1, t), jnp.float32)
    r = 0
    while r < n_rows:                          # static Python loop over pl.ds row slices
        c = min(row_chunk, n_rows - r)
        s1 = s1 + jnp.sum(x1_ref[pl.ds(r, c), :].astype(jnp.float32), axis=0, keepdims=True)
        s2 = s2 + jnp.sum(x2_ref[pl.ds(r, c), :].astype(jnp.float32), axis=0, keepdims=True)
        r += c
    m1 = s1 * inv_n                            # (1, T) means
    m2 = s2 * inv_n

    # ---- pass 2: higher central-moment sums, streamed; powers via running products ----
    accs = [jnp.zeros((1, t), jnp.float32) for _ in range(n_moments - 1)]
    r = 0
    while r < n_rows:
        c = min(row_chunk, n_rows - r)
        c1 = x1_ref[pl.ds(r, c), :].astype(jnp.float32) - m1   # centered chunk (C, T)
        c2 = x2_ref[pl.ds(r, c), :].astype(jnp.float32) - m2
        p1 = c1
        p2 = c2
        for k in range(n_moments - 1):         # k -> moment order k+2, VPU multiplies only
            p1 = p1 * c1
            p2 = p2 * c2
            accs[k] = accs[k] + (jnp.sum(p1, axis=0, keepdims=True)
                                 - jnp.sum(p2, axis=0, keepdims=True))
        r += c

    # ---- per-feature squared diffs with exact 1/N folded in ----
    d1 = m1 - m2
    rows_sq = [d1 * d1]
    for k in range(n_moments - 1):
        dk = accs[k] * inv_n                   # mean(sx1^k) - mean(sx2^k), per feature
        rows_sq.append(dk * dk)

    # ---- lane-fold each (1, T) row to (1, 128) and store per-moment (static index) ----
    folds = t // 128
    for m, row in enumerate(rows_sq):
        part = row[:, 0:128]
        for b in range(1, folds):
            part = part + row[:, b * 128:(b + 1) * 128]
        sq_ref[pl.ds(m, 1), :] = part


def _vmem_capacity_bytes() -> int:
    try:
        return int(pltpu.get_tpu_info().vmem_capacity_bytes)
    except Exception:
        return 128 * 1024 * 1024


_TILE_EFFICIENCY = {128: 0.30, 256: 0.63, 512: 0.85}   # measured HBM-roofline fractions


def _round_up(x: int, m: int) -> int:
    return ((x + m - 1) // m) * m


def _pick_tile_and_pad(n_rows: int, d: int, in_itemsize: int):
    """Returns (tile_d, padded_d); padded_d is a multiple of tile_d and of 128."""
    vmem_cap = _vmem_capacity_bytes()
    # Leave headroom below physical VMEM for Mosaic internal scratch.
    budget = min(int(0.75 * vmem_cap), 96 * 1024 * 1024)
    # Streaming kernel: per lane-column VMEM is just 2 inputs x 2 pipeline buffers
    # (input dtype) plus tiny f32 accumulators / output.
    bytes_per_lane = 2 * 2 * n_rows * in_itemsize + 2 * 8 * 4

    d128 = _round_up(d, 128)
    if d128 <= 512 and d128 * bytes_per_lane <= budget:
        return d128, d128                       # small feature dim: one lane-aligned tile

    best = None
    for t in (128, 256, 512):
        if t * bytes_per_lane > budget:
            continue
        d_pad = _round_up(d, t)                 # zero-pad D: exact for every moment
        cost = d_pad / _TILE_EFFICIENCY[t]      # ~ relative HBM time
        if best is None or cost < best[2]:
            best = (t, d_pad, cost)
    if best is None:
        # TODO(synk): N-tiled two-pass formulation for very large N.
        raise ValueError(
            f"CMD kernel: n_rows={n_rows} too large for a VMEM-resident D-tile "
            f"(budget={budget} bytes); N-tiling is not implemented.")
    return best[0], best[1]


def _vmem_limit_bytes(n_rows, tile_d, in_itemsize, n_moments, row_chunk):
    vmem_cap = _vmem_capacity_bytes()
    cap = 96 * 1024 * 1024 if vmem_cap >= 100 * 1024 * 1024 else 48 * 1024 * 1024
    est = (2 * 2 * n_rows * tile_d * in_itemsize        # 2 inputs x double buffer
           + 2 * n_moments * 128 * 4                    # output double buffer
           + (4 * row_chunk + 2 * (n_moments + 1)) * tile_d * 4)   # live f32 values
    return int(min(max(2 * est, 32 * 1024 * 1024), cap))


def cmd(x1, x2, n_moments: int):
    """Pallas CMD: returns a scalar jnp.float32 (matches PyTorch CMD.forward)."""
    assert x1.shape == x2.shape and x1.ndim == 2
    assert x1.dtype == x2.dtype
    n, d = x1.shape
    in_itemsize = jnp.dtype(x1.dtype).itemsize
    row_chunk = max(8, 32 // in_itemsize)       # 8 rows f32 / 16 rows bf16 per streamed chunk

    tile_d, d_pad = _pick_tile_and_pad(n, d, in_itemsize)
    if d_pad != d:
        # Zero columns are exact: their means / centered powers are all zero.
        pad = ((0, 0), (0, d_pad - d))
        x1 = jnp.pad(x1, pad)
        x2 = jnp.pad(x2, pad)
    num_tiles = d_pad // tile_d

    kernel = functools.partial(cmd_kernel, n_moments=n_moments, n_rows=n,
                               row_chunk=row_chunk)
    sq = pl.pallas_call(
        kernel,
        out_shape=jax.ShapeDtypeStruct((n_moments, 128 * num_tiles), jnp.float32),
        grid_spec=pltpu.PrefetchScalarGridSpec(
            num_scalar_prefetch=0,
            grid=(num_tiles,),
            in_specs=[
                pl.BlockSpec((n, tile_d), lambda j: (0, j)),
                pl.BlockSpec((n, tile_d), lambda j: (0, j)),
            ],
            out_specs=pl.BlockSpec((n_moments, 128), lambda j: (0, j)),
        ),
        compiler_params=pltpu.CompilerParams(
            dimension_semantics=("parallel",),
            vmem_limit_bytes=_vmem_limit_bytes(n, tile_d, in_itemsize, n_moments, row_chunk),
        ),
    )(x1, x2)

    # Tiny wrapper-side reduction: sum lane-partials per moment, sqrt, sum over moments.
    per_moment = jnp.sqrt(jnp.sum(sq, axis=1))
    return jnp.sum(per_moment)


def cmd_reference(x1, x2, n_moments: int):
    # Pure-JAX reference mirroring the PyTorch module exactly.
    mx1 = jnp.mean(x1, axis=0)
    mx2 = jnp.mean(x2, axis=0)
    sx1 = x1 - mx1
    sx2 = x2 - mx2

    def matchnorm(a, b):
        return jnp.sum((a - b) ** 2) ** 0.5

    scms = matchnorm(mx1, mx2)
    for i in range(n_moments - 1):
        k = i + 2
        ss1 = jnp.mean(sx1 ** k, axis=0)
        ss2 = jnp.mean(sx2 ** k, axis=0)
        scms = scms + matchnorm(ss1, ss2)
    return scms


if __name__ == "__main__":
    key = jax.random.PRNGKey(0)
    k1, k2, k3, k4 = jax.random.split(key, 4)
    n_moments = 5   # MISA calls loss_cmd(...) with n_moments=5

    # Case 1: f32, D = 256 -> single lane-aligned tile.
    N, D = 8, 256
    x1 = jax.random.normal(k1, (N, D), dtype=jnp.float32)
    x2 = jax.random.normal(k2, (N, D), dtype=jnp.float32) * 0.8 + 0.1
    out = jax.block_until_ready(cmd(x1, x2, n_moments))
    ref = cmd_reference(x1, x2, n_moments)
    assert jnp.allclose(out, ref, rtol=1e-5, atol=1e-5), (out, ref)

    # Case 2: bf16 ingest (half the HBM bytes), f32 accumulation in-kernel, 16-row chunks.
    xb1 = jax.random.normal(k3, (N, D), dtype=jnp.float32).astype(jnp.bfloat16)
    xb2 = (jax.random.normal(k4, (N, D), dtype=jnp.float32) * 0.8 + 0.1).astype(jnp.bfloat16)
    out_b = jax.block_until_ready(cmd(xb1, xb2, n_moments))
    ref_b = cmd_reference(xb1.astype(jnp.float32), xb2.astype(jnp.float32), n_moments)
    assert jnp.allclose(out_b, ref_b, rtol=1e-4, atol=1e-4), (out_b, ref_b)

    # Case 3: small / irregular feature dim (not a multiple of 128) -> zero-padded to 128.
    N2, D2 = 6, 96
    y1 = jax.random.normal(k1, (N2, D2), dtype=jnp.float32)
    y2 = jax.random.normal(k2, (N2, D2), dtype=jnp.float32) * 1.2 - 0.2
    out2 = jax.block_until_ready(cmd(y1, y2, n_moments))
    ref2 = cmd_reference(y1, y2, n_moments)
    assert jnp.allclose(out2, ref2, rtol=1e-5, atol=1e-5), (out2, ref2)

    # Case 4: multi-tile grid + D padding + full & partial row chunks (N=13 -> 8+5).
    N3, D3 = 13, 640
    z1 = jax.random.normal(k3, (N3, D3), dtype=jnp.float32)
    z2 = jax.random.normal(k4, (N3, D3), dtype=jnp.float32) * 0.9 + 0.05
    out3 = jax.block_until_ready(cmd(z1, z2, n_moments))
    ref3 = cmd_reference(z1, z2, n_moments)
    assert jnp.allclose(out3, ref3, rtol=1e-5, atol=1e-5), (out3, ref3)

    print("KERNEL_OK")
</pallas_src>

<mosaic_0001>
module attributes {stable_mosaic.version = 11 : i64} {
  func.func @cmd_kernel(%arg0: i32, %arg1: memref<8x256xf32, #tpu.memory_space<vmem>>, %arg2: memref<8x256xf32, #tpu.memory_space<vmem>>, %arg3: memref<5x128xf32, #tpu.memory_space<vmem>>) attributes {dimension_semantics = [#tpu.dimension_semantics<parallel>], iteration_bounds = array<i64: 1>, scalar_prefetch = 0 : i64, scratch_operands = 0 : i64, tpu.core_type = #tpu.core_type<tc>, window_params = [{transform_indices = @transform_0, window_bounds = array<i64: 8, 256>}, {transform_indices = @transform_1, window_bounds = array<i64: 8, 256>}, {transform_indices = @transform_2, window_bounds = array<i64: 5, 128>}]} {
    %cst = arith.constant 0.000000e+00 : f32
    %0 = vector.broadcast %cst : f32 to vector<1x256xf32>
    %cst_0 = arith.constant 0.000000e+00 : f32
    %1 = vector.broadcast %cst_0 : f32 to vector<1x256xf32>
    %c0 = arith.constant 0 : index
    %c0_1 = arith.constant 0 : index
    %2 = vector.load %arg1[%c0, %c0_1] : memref<8x256xf32, #tpu.memory_space<vmem>>, vector<8x256xf32>
    %cst_2 = arith.constant dense<0.000000e+00> : vector<256xf32>
    %3 = vector.multi_reduction <add>, %2, %cst_2 [0] : vector<8x256xf32> to vector<256xf32>
    %4 = vector.shape_cast %3 : vector<256xf32> to vector<1x256xf32>
    %5 = arith.addf %0, %4 : vector<1x256xf32>
    %c0_3 = arith.constant 0 : index
    %c0_4 = arith.constant 0 : index
    %6 = vector.load %arg2[%c0_3, %c0_4] : memref<8x256xf32, #tpu.memory_space<vmem>>, vector<8x256xf32>
    %cst_5 = arith.constant dense<0.000000e+00> : vector<256xf32>
    %7 = vector.multi_reduction <add>, %6, %cst_5 [0] : vector<8x256xf32> to vector<256xf32>
    %8 = vector.shape_cast %7 : vector<256xf32> to vector<1x256xf32>
    %9 = arith.addf %1, %8 : vector<1x256xf32>
    %cst_6 = arith.constant 1.250000e-01 : f32
    %10 = vector.broadcast %cst_6 : f32 to vector<1x256xf32>
    %11 = arith.mulf %5, %10 : vector<1x256xf32>
    %cst_7 = arith.constant 1.250000e-01 : f32
    %12 = vector.broadcast %cst_7 : f32 to vector<1x256xf32>
    %13 = arith.mulf %9, %12 : vector<1x256xf32>
    %cst_8 = arith.constant 0.000000e+00 : f32
    %14 = vector.broadcast %cst_8 : f32 to vector<1x256xf32>
    %cst_9 = arith.constant 0.000000e+00 : f32
    %15 = vector.broadcast %cst_9 : f32 to vector<1x256xf32>
    %cst_10 = arith.constant 0.000000e+00 : f32
    %16 = vector.broadcast %cst_10 : f32 to vector<1x256xf32>
    %cst_11 = arith.constant 0.000000e+00 : f32
    %17 = vector.broadcast %cst_11 : f32 to vector<1x256xf32>
    %c0_12 = arith.constant 0 : index
    %c0_13 = arith.constant 0 : index
    %18 = vector.load %arg1[%c0_12, %c0_13] : memref<8x256xf32, #tpu.memory_space<vmem>>, vector<8x256xf32>
    %19 = vector.broadcast %11 : vector<1x256xf32> to vector<8x256xf32>
    %20 = arith.subf %18, %19 : vector<8x256xf32>
    %c0_14 = arith.constant 0 : index
    %c0_15 = arith.constant 0 : index
    %21 = vector.load %arg2[%c0_14, %c0_15] : memref<8x256xf32, #tpu.memory_space<vmem>>, vector<8x256xf32>
    %22 = vector.broadcast %13 : vector<1x256xf32> to vector<8x256xf32>
    %23 = arith.subf %21, %22 : vector<8x256xf32>
    %24 = arith.mulf %20, %20 : vector<8x256xf32>
    %25 = arith.mulf %23, %23 : vector<8x256xf32>
    %cst_16 = arith.constant dense<0.000000e+00> : vector<256xf32>
    %26 = vector.multi_reduction <add>, %24, %cst_16 [0] : vector<8x256xf32> to vector<256xf32>
    %27 = vector.shape_cast %26 : vector<256xf32> to vector<1x256xf32>
    %cst_17 = arith.constant dense<0.000000e+00> : vector<256xf32>
    %28 = vector.multi_reduction <add>, %25, %cst_17 [0] : vector<8x256xf32> to vector<256xf32>
    %29 = vector.shape_cast %28 : vector<256xf32> to vector<1x256xf32>
    %30 = arith.subf %27, %29 : vector<1x256xf32>
    %31 = arith.addf %14, %30 : vector<1x256xf32>
    %32 = arith.mulf %24, %20 : vector<8x256xf32>
    %33 = arith.mulf %25, %23 : vector<8x256xf32>
    %cst_18 = arith.constant dense<0.000000e+00> : vector<256xf32>
    %34 = vector.multi_reduction <add>, %32, %cst_18 [0] : vector<8x256xf32> to vector<256xf32>
    %35 = vector.shape_cast %34 : vector<256xf32> to vector<1x256xf32>
    %cst_19 = arith.constant dense<0.000000e+00> : vector<256xf32>
    %36 = vector.multi_reduction <add>, %33, %cst_19 [0] : vector<8x256xf32> to vector<256xf32>
    %37 = vector.shape_cast %36 : vector<256xf32> to vector<1x256xf32>
    %38 = arith.subf %35, %37 : vector<1x256xf32>
    %39 = arith.addf %15, %38 : vector<1x256xf32>
    %40 = arith.mulf %32, %20 : vector<8x256xf32>
    %41 = arith.mulf %33, %23 : vector<8x256xf32>
    %cst_20 = arith.constant dense<0.000000e+00> : vector<256xf32>
    %42 = vector.multi_reduction <add>, %40, %cst_20 [0] : vector<8x256xf32> to vector<256xf32>
    %43 = vector.shape_cast %42 : vector<256xf32> to vector<1x256xf32>
    %cst_21 = arith.constant dense<0.000000e+00> : vector<256xf32>
    %44 = vector.multi_reduction <add>, %41, %cst_21 [0] : vector<8x256xf32> to vector<256xf32>
    %45 = vector.shape_cast %44 : vector<256xf32> to vector<1x256xf32>
    %46 = arith.subf %43, %45 : vector<1x256xf32>
    %47 = arith.addf %16, %46 : vector<1x256xf32>
    %48 = arith.mulf %40, %20 : vector<8x256xf32>
    %49 = arith.mulf %41, %23 : vector<8x256xf32>
    %cst_22 = arith.constant dense<0.000000e+00> : vector<256xf32>
    %50 = vector.multi_reduction <add>, %48, %cst_22 [0] : vector<8x256xf32> to vector<256xf32>
    %51 = vector.shape_cast %50 : vector<256xf32> to vector<1x256xf32>
    %cst_23 = arith.constant dense<0.000000e+00> : vector<256xf32>
    %52 = vector.multi_reduction <add>, %49, %cst_23 [0] : vector<8x256xf32> to vector<256xf32>
    %53 = vector.shape_cast %52 : vector<256xf32> to vector<1x256xf32>
    %54 = arith.subf %51, %53 : vector<1x256xf32>
    %55 = arith.addf %17, %54 : vector<1x256xf32>
    %56 = arith.subf %11, %13 : vector<1x256xf32>
    %57 = arith.mulf %56, %56 : vector<1x256xf32>
    %cst_24 = arith.constant 1.250000e-01 : f32
    %58 = vector.broadcast %cst_24 : f32 to vector<1x256xf32>
    %59 = arith.mulf %31, %58 : vector<1x256xf32>
    %60 = arith.mulf %59, %59 : vector<1x256xf32>
    %cst_25 = arith.constant 1.250000e-01 : f32
    %61 = vector.broadcast %cst_25 : f32 to vector<1x256xf32>
    %62 = arith.mulf %39, %61 : vector<1x256xf32>
    %63 = arith.mulf %62, %62 : vector<1x256xf32>
    %cst_26 = arith.constant 1.250000e-01 : f32
    %64 = vector.broadcast %cst_26 : f32 to vector<1x256xf32>
    %65 = arith.mulf %47, %64 : vector<1x256xf32>
    %66 = arith.mulf %65, %65 : vector<1x256xf32>
    %cst_27 = arith.constant 1.250000e-01 : f32
    %67 = vector.broadcast %cst_27 : f32 to vector<1x256xf32>
    %68 = arith.mulf %55, %67 : vector<1x256xf32>
    %69 = arith.mulf %68, %68 : vector<1x256xf32>
    %70 = vector.extract_strided_slice %57 {offsets = [0, 0], sizes = [1, 128], strides = [1, 1]} : vector<1x256xf32> to vector<1x128xf32>
    %71 = vector.extract_strided_slice %57 {offsets = [0, 128], sizes = [1, 128], strides = [1, 1]} : vector<1x256xf32> to vector<1x128xf32>
    %72 = arith.addf %70, %71 : vector<1x128xf32>
    %c0_28 = arith.constant 0 : index
    %c0_29 = arith.constant 0 : index
    %73 = vector.load %arg3[%c0_28, %c0_29] : memref<5x128xf32, #tpu.memory_space<vmem>>, vector<1x128xf32>
    tpu.vector_store %arg3[%c0_28, %c0_29], %72 {strides = array<i32>} : memref<5x128xf32, #tpu.memory_space<vmem>>, vector<1x128xf32>,
    %74 = vector.extract_strided_slice %60 {offsets = [0, 0], sizes = [1, 128], strides = [1, 1]} : vector<1x256xf32> to vector<1x128xf32>
    %75 = vector.extract_strided_slice %60 {offsets = [0, 128], sizes = [1, 128], strides = [1, 1]} : vector<1x256xf32> to vector<1x128xf32>
    %76 = arith.addf %74, %75 : vector<1x128xf32>
    %c1 = arith.constant 1 : index
    %c0_30 = arith.constant 0 : index
    %77 = vector.load %arg3[%c1, %c0_30] : memref<5x128xf32, #tpu.memory_space<vmem>>, vector<1x128xf32>
    tpu.vector_store %arg3[%c1, %c0_30], %76 {strides = array<i32>} : memref<5x128xf32, #tpu.memory_space<vmem>>, vector<1x128xf32>,
    %78 = vector.extract_strided_slice %63 {offsets = [0, 0], sizes = [1, 128], strides = [1, 1]} : vector<1x256xf32> to vector<1x128xf32>
    %79 = vector.extract_strided_slice %63 {offsets = [0, 128], sizes = [1, 128], strides = [1, 1]} : vector<1x256xf32> to vector<1x128xf32>
    %80 = arith.addf %78, %79 : vector<1x128xf32>
    %c2 = arith.constant 2 : index
    %c0_31 = arith.constant 0 : index
    %81 = vector.load %arg3[%c2, %c0_31] : memref<5x128xf32, #tpu.memory_space<vmem>>, vector<1x128xf32>
    tpu.vector_store %arg3[%c2, %c0_31], %80 {strides = array<i32>} : memref<5x128xf32, #tpu.memory_space<vmem>>, vector<1x128xf32>,
    %82 = vector.extract_strided_slice %66 {offsets = [0, 0], sizes = [1, 128], strides = [1, 1]} : vector<1x256xf32> to vector<1x128xf32>
    %83 = vector.extract_strided_slice %66 {offsets = [0, 128], sizes = [1, 128], strides = [1, 1]} : vector<1x256xf32> to vector<1x128xf32>
    %84 = arith.addf %82, %83 : vector<1x128xf32>
    %c3 = arith.constant 3 : index
    %c0_32 = arith.constant 0 : index
    %85 = vector.load %arg3[%c3, %c0_32] : memref<5x128xf32, #tpu.memory_space<vmem>>, vector<1x128xf32>
    tpu.vector_store %arg3[%c3, %c0_32], %84 {strides = array<i32>} : memref<5x128xf32, #tpu.memory_space<vmem>>, vector<1x128xf32>,
    %86 = vector.extract_strided_slice %69 {offsets = [0, 0], sizes = [1, 128], strides = [1, 1]} : vector<1x256xf32> to vector<1x128xf32>
    %87 = vector.extract_strided_slice %69 {offsets = [0, 128], sizes = [1, 128], strides = [1, 1]} : vector<1x256xf32> to vector<1x128xf32>
    %88 = arith.addf %86, %87 : vector<1x128xf32>
    %c4 = arith.constant 4 : index
    %c0_33 = arith.constant 0 : index
    %89 = vector.load %arg3[%c4, %c0_33] : memref<5x128xf32, #tpu.memory_space<vmem>>, vector<1x128xf32>
    tpu.vector_store %arg3[%c4, %c0_33], %88 {strides = array<i32>} : memref<5x128xf32, #tpu.memory_space<vmem>>, vector<1x128xf32>,
    return
  }
  func.func @transform_0(%arg0: i32) -> (i32, i32) {
    %c0_i32 = arith.constant 0 : i32
    %c0_i32_0 = arith.constant 0 : i32
    return %c0_i32, %arg0 : i32, i32
  }
  func.func @transform_1(%arg0: i32) -> (i32, i32) {
    %c0_i32 = arith.constant 0 : i32
    %c0_i32_0 = arith.constant 0 : i32
    return %c0_i32, %arg0 : i32, i32
  }
  func.func @transform_2(%arg0: i32) -> (i32, i32) {
    %c0_i32 = arith.constant 0 : i32
    %c0_i32_0 = arith.constant 0 : i32
    return %c0_i32, %arg0 : i32, i32
  }
}

</mosaic_0001>

<bundles_post_ra>
// kernel: tpu_custom_call.1
= control target key start
LH: loop header
LB: loop body
LE: loop exit
PB: predicated region body
PF: predicated region fallthrough
CT: control target
= control target key end

     0   :  { %7 = vsyncpa [#allocation3], 0  ;;  %s392_s0 = inlined_call_operand.hbm [shape: f32[8,256], index: 0, kind: input, shape index: {}]   ;;  %s393_s1 = inlined_call_operand.hbm [shape: f32[8,256], index: 1, kind: input, shape index: {}]   ;;  %s394_s2 = inlined_call_operand.hbm [shape: f32[5,128], index: 2, kind: output, shape index: {}]  }
   0x1   :  { %8 = vsyncpa [#allocation6], 0 }
   0x2   :  { %9 = vsyncpa [#allocation4], 0  ;;  %s15_s11 = sshll.u32 %s392_s0, 4  ;;  %s337_s12 = smov [#allocation2]   ;;  %s16_s11 = int_to_ptr.hbm [resolvable:$true] %s15_s11 }
   0x3   :  { %s17_s13 = sshll.u32 %s337_s12, 4  ;;  %s26_s16 = sshll.u32 %s393_s1, 4  ;;  %s18_s13 = int_to_ptr.vmem [resolvable:$true] %s17_s13  ;;  %s27_s16 = int_to_ptr.hbm [resolvable:$true] %s26_s16 }
   0x4   :  { %20 = dma.hbm_to_vmem [thread:$0]  %s16_s11, 256, %s18_s13, [#allocation3]  }
   0x5   :  { %s338_s17 = smov [#allocation5]  }
   0x6   :  { %s28_s18 = sshll.u32 %s338_s17, 4  ;;  %s29_s18 = int_to_ptr.vmem [resolvable:$true] %s28_s18 }
   0x7   :  { %31 = dma.hbm_to_vmem [thread:$0]  %s27_s16, 256, %s29_s18, [#allocation6]  }
   0x8   :  { %331 = dma.done.wait [#allocation3], 256  }
   0x9   :  { %332 = vsyncadd [#allocation3], 4294967040 }
   0xa   :  { %333 = dma.done.wait [#allocation6], 256  }
   0xb   :  { %334 = vsyncadd [#allocation6], 4294967040  ;;  %v40_v0 = vld [vmem:[#allocation2] sm:$0xff]  ;;  %v41_v1 = vld [vmem:[#allocation2 + $0x8] sm:$0xff]  ;;  %s339_s0 = smov [#allocation7]   ;;  %s245_s21 = sshll.u32 %s394_s2, 4  ;;  %s246_s21 = int_to_ptr.hbm [resolvable:$true] %s245_s21 }
   0xc   :  { %v56_v2 = vld [vmem:[#allocation5] sm:$0xff]  ;;  %v42_v3 = vrot.slane %v40_v0, 4  ;;  %v48_v4 = vrot.slane %v41_v1, 4  ;;  %v57_v5 = vld [vmem:[#allocation5 + $0x8] sm:$0xff]  ;;  %s243_s1 = sshll.u32 %s339_s0, 4  ;;  %s244_s1 = int_to_ptr.vmem [resolvable:$true] %s243_s1 }
   0xd   :  { %v58_v6 = vrot.slane %v56_v2, 4  ;;  %v64_v7 = vrot.slane %v57_v5, 4 }
   0xe   :  { %v43_v8 = vadd.f32 %v42_v3, %v40_v0  ;;  %v49_v9 = vadd.f32 %v48_v4, %v41_v1 }
   0xf   :  { %v59_v10 = vadd.f32 %v58_v6, %v56_v2  ;;  %v65_v11 = vadd.f32 %v64_v7, %v57_v5 }
  0x10   :  { %v44_v12 = vrot.slane %v43_v8, 2  ;;  %v50_v13 = vrot.slane %v49_v9, 2 }
  0x11   :  { %v60_v14 = vrot.slane %v59_v10, 2  ;;  %v66_v15 = vrot.slane %v65_v11, 2 }
  0x12   :  { %v45_v16 = vadd.f32 %v44_v12, %v43_v8  ;;  %v51_v17 = vadd.f32 %v50_v13, %v49_v9 }
  0x13   :  { %v61_v18 = vadd.f32 %v60_v14, %v59_v10  ;;  %v67_v19 = vadd.f32 %v66_v15, %v65_v11 }
  0x14   :  { %v46_v20 = vrot.slane %v45_v16, 1  ;;  %v52_v21 = vrot.slane %v51_v17, 1 }
  0x15   :  { %v62_v22 = vrot.slane %v61_v18, 1  ;;  %v68_v23 = vrot.slane %v67_v19, 1 }
  0x16   :  { %v47_v24 = vadd.f32 %v46_v20, %v45_v16  ;;  %v53_v25 = vadd.f32 %v52_v21, %v51_v17 }
  0x17   :  { %v63_v26 = vadd.f32 %v62_v22, %v61_v18  ;;  %v69_v27 = vadd.f32 %v68_v23, %v67_v19 }
  0x18   :  { %v72_v28 = vmul.f32 0.125, %v47_v24  ;;  %v73_v29 = vmul.f32 0.125, %v53_v25 }
  0x19   :  { %v74_v30 = vmul.f32 0.125, %v63_v26  ;;  %v75_v31 = vmul.f32 0.125, %v69_v27 }
  0x1a   :  { %v361_v32 = vsub.f32 %v40_v0, %v72_v28  ;;  %v363_v33 = vsub.f32 %v41_v1, %v73_v29 }
  0x1b   :  { %v365_v34 = vsub.f32 %v56_v2, %v74_v30  ;;  %v208_v35 = vsub.f32 %v72_v28, %v74_v30  ;;  %v367_v36 = vsub.f32 %v57_v5, %v75_v31  ;;  %v209_v37 = vsub.f32 %v73_v29, %v75_v31 }
  0x1c   :  { %v80_v39 = vmul.f32 %v361_v32, %v361_v32  ;;  %v81_v40 = vmul.f32 %v363_v33, %v363_v33 }
  0x1d   :  { %v210_v38 = vmul.f32 %v208_v35, %v208_v35  ;;  %v82_v41 = vmul.f32 %v365_v34, %v365_v34  ;;  %v211_v42 = vmul.f32 %v209_v37, %v209_v37  ;;  %v83_v43 = vmul.f32 %v367_v36, %v367_v36 }
  0x1e   :  { %v84_v44 = vrot.slane %v80_v39, 4  ;;  %v90_v45 = vrot.slane %v81_v40, 4  ;;  %v112_v47 = vmul.f32 %v80_v39, %v361_v32  ;;  %v113_v50 = vmul.f32 %v81_v40, %v363_v33 }
  0x1f   :  { %v96_v46 = vrot.slane %v82_v41, 4  ;;  %v228_v48 = vadd.f32 %v211_v42, %v210_v38  ;;  %v102_v49 = vrot.slane %v83_v43, 4  ;;  %v114_v51 = vmul.f32 %v82_v41, %v365_v34 }
  0x20   :  { %v85_v52 = vadd.f32 %v84_v44, %v80_v39  ;;  %v91_v53 = vadd.f32 %v90_v45, %v81_v40  ;;  %v115_v55 = vmul.f32 %v83_v43, %v367_v36  ;;  %v116_v57 = vrot.slane %v112_v47, 4 }
  0x21   :  { %v97_v54 = vadd.f32 %v96_v46, %v82_v41  ;;  %229 = vst [vmem:[#allocation7] sm:$0x1] %v228_v48  ;;  %v103_v56 = vadd.f32 %v102_v49, %v83_v43  ;;  %v122_v58 = vrot.slane %v113_v50, 4  ;;  %v128_v59 = vrot.slane %v114_v51, 4 }
  0x22   :  { %v86_v60 = vrot.slane %v85_v52, 2  ;;  %v92_v61 = vrot.slane %v91_v53, 2  ;;  %v134_v63 = vrot.slane %v115_v55, 4  ;;  %v117_v1 = vadd.f32 %v116_v57, %v112_v47 }
  0x23   :  { %v98_v62 = vrot.slane %v97_v54, 2  ;;  %v104_v0 = vrot.slane %v103_v56, 2  ;;  %v123_v2 = vadd.f32 %v122_v58, %v113_v50  ;;  %v129_v3 = vadd.f32 %v128_v59, %v114_v51 }
  0x24   :  { %v87_v4 = vadd.f32 %v86_v60, %v85_v52  ;;  %v93_v5 = vadd.f32 %v92_v61, %v91_v53  ;;  %v135_v7 = vadd.f32 %v134_v63, %v115_v55  ;;  %v118_v9 = vrot.slane %v117_v1, 2 }
  0x25   :  { %v99_v6 = vadd.f32 %v98_v62, %v97_v54  ;;  %v105_v8 = vadd.f32 %v104_v0, %v103_v56  ;;  %v124_v10 = vrot.slane %v123_v2, 2  ;;  %v130_v11 = vrot.slane %v129_v3, 2 }
  0x26   :  { %v88_v12 = vrot.slane %v87_v4, 1  ;;  %v94_v13 = vrot.slane %v93_v5, 1  ;;  %v136_v15 = vrot.slane %v135_v7, 2  ;;  %v119_v17 = vadd.f32 %v118_v9, %v117_v1 }
  0x27   :  { %v100_v14 = vrot.slane %v99_v6, 1  ;;  %v106_v16 = vrot.slane %v105_v8, 1  ;;  %v125_v18 = vadd.f32 %v124_v10, %v123_v2  ;;  %v131_v19 = vadd.f32 %v130_v11, %v129_v3 }
  0x28   :  { %v89_v20 = vadd.f32 %v88_v12, %v87_v4  ;;  %v95_v21 = vadd.f32 %v94_v13, %v93_v5  ;;  %v137_v23 = vadd.f32 %v136_v15, %v135_v7  ;;  %v120_v25 = vrot.slane %v119_v17, 1 }
  0x29   :  { %v101_v22 = vadd.f32 %v100_v14, %v99_v6  ;;  %v107_v24 = vadd.f32 %v106_v16, %v105_v8  ;;  %v126_v26 = vrot.slane %v125_v18, 1  ;;  %v132_v27 = vrot.slane %v131_v19, 1 }
  0x2a   :  { %v138_v29 = vrot.slane %v137_v23, 1  ;;  %v144_v30 = vmul.f32 %v112_v47, %v361_v32  ;;  %v145_v31 = vmul.f32 %v113_v50, %v363_v33  ;;  %v121_v37 = vadd.f32 %v120_v25, %v119_v17 }
  0x2b   :  { %v108_v28 = vsub.f32 %v89_v20, %v101_v22  ;;  %v109_v35 = vsub.f32 %v95_v21, %v107_v24  ;;  %v127_v38 = vadd.f32 %v126_v26, %v125_v18  ;;  %v133_v39 = vadd.f32 %v132_v27, %v131_v19 }
  0x2c   :  { %v139_v41 = vadd.f32 %v138_v29, %v137_v23  ;;  %v146_v42 = vmul.f32 %v114_v51, %v365_v34  ;;  %v147_v43 = vmul.f32 %v115_v55, %v367_v36  ;;  %v148_v46 = vrot.slane %v144_v30, 4 }
  0x2d   :  { %v212_v40 = vmul.f32 0.125, %v108_v28  ;;  %v213_v44 = vmul.f32 0.125, %v109_v35  ;;  %v140_v45 = vsub.f32 %v121_v37, %v133_v39  ;;  %v154_v48 = vrot.slane %v145_v31, 4 }
  0x2e   :  { %v141_v52 = vsub.f32 %v127_v38, %v139_v41  ;;  %v160_v53 = vrot.slane %v146_v42, 4  ;;  %v166_v47 = vrot.slane %v147_v43, 4  ;;  %v149_v56 = vadd.f32 %v148_v46, %v144_v30 }
  0x2f   :  { %v214_v49 = vmul.f32 %v212_v40, %v212_v40  ;;  %v215_v54 = vmul.f32 %v213_v44, %v213_v44  ;;  %v216_v50 = vmul.f32 0.125, %v140_v45  ;;  %v155_v57 = vadd.f32 %v154_v48, %v145_v31 }
  0x30   :  { %v217_v58 = vmul.f32 0.125, %v141_v52  ;;  %v161_v59 = vadd.f32 %v160_v53, %v146_v42  ;;  %v167_v60 = vadd.f32 %v166_v47, %v147_v43  ;;  %v176_v61 = vmul.f32 %v144_v30, %v361_v32 }
  0x31   :  { %v230_v51 = vadd.f32 %v215_v54, %v214_v49  ;;  %v218_v62 = vmul.f32 %v216_v50, %v216_v50  ;;  %v150_v55 = vrot.slane %v149_v56, 2  ;;  %v156_v63 = vrot.slane %v155_v57, 2 }
  0x32   :  { %v219_v0 = vmul.f32 %v217_v58, %v217_v58  ;;  %v162_v1 = vrot.slane %v161_v59, 2  ;;  %v168_v2 = vrot.slane %v167_v60, 2  ;;  %v177_v3 = vmul.f32 %v145_v31, %v363_v33 }
  0x33   :  { %231 = vst [vmem:[#allocation7 + $0x1] sm:$0x1] %v230_v51  ;;  %v151_v4 = vadd.f32 %v150_v55, %v149_v56  ;;  %v157_v5 = vadd.f32 %v156_v63, %v155_v57  ;;  %v178_v6 = vmul.f32 %v146_v42, %v365_v34  ;;  %v179_v7 = vmul.f32 %v147_v43, %v367_v36 }
  0x34   :  { %v232_v8 = vadd.f32 %v219_v0, %v218_v62  ;;  %v163_v9 = vadd.f32 %v162_v1, %v161_v59  ;;  %v169_v10 = vadd.f32 %v168_v2, %v167_v60  ;;  %v180_v32 = vrot.slane %v176_v61, 4 }
  0x35   :  { %v152_v11 = vrot.slane %v151_v4, 1  ;;  %v158_v12 = vrot.slane %v157_v5, 1  ;;  %v186_v13 = vrot.slane %v177_v3, 4  ;;  %v192_v14 = vrot.slane %v178_v6, 4 }
  0x36   :  { %233 = vst [vmem:[#allocation7 + $0x2] sm:$0x1] %v232_v8  ;;  %v164_v15 = vrot.slane %v163_v9, 1  ;;  %v170_v16 = vrot.slane %v169_v10, 1  ;;  %v181_v17 = vadd.f32 %v180_v32, %v176_v61  ;;  %v198_v33 = vrot.slane %v179_v7, 4 }
  0x37   :  { %v153_v18 = vadd.f32 %v152_v11, %v151_v4  ;;  %v159_v19 = vadd.f32 %v158_v12, %v157_v5  ;;  %v187_v20 = vadd.f32 %v186_v13, %v177_v3  ;;  %v193_v21 = vadd.f32 %v192_v14, %v178_v6 }
  0x38   :  { %v165_v34 = vadd.f32 %v164_v15, %v163_v9  ;;  %v171_v22 = vadd.f32 %v170_v16, %v169_v10  ;;  %v182_v36 = vrot.slane %v181_v17, 2  ;;  %v199_v23 = vadd.f32 %v198_v33, %v179_v7 }
  0x39   :  { %v188_v24 = vrot.slane %v187_v20, 2  ;;  %v194_v25 = vrot.slane %v193_v21, 2 }
  0x3a   :  { %v172_v26 = vsub.f32 %v153_v18, %v165_v34  ;;  %v173_v27 = vsub.f32 %v159_v19, %v171_v22  ;;  %v183_v28 = vadd.f32 %v182_v36, %v181_v17  ;;  %v200_v29 = vrot.slane %v199_v23, 2 }
  0x3b   :  { %v189_v30 = vadd.f32 %v188_v24, %v187_v20  ;;  %v195_v31 = vadd.f32 %v194_v25, %v193_v21 }
  0x3c   :  { %v220_v35 = vmul.f32 0.125, %v172_v26  ;;  %v221_v37 = vmul.f32 0.125, %v173_v27  ;;  %v184_v38 = vrot.slane %v183_v28, 1  ;;  %v201_v39 = vadd.f32 %v200_v29, %v199_v23 }
  0x3d   :  { %v190_v40 = vrot.slane %v189_v30, 1  ;;  %v196_v41 = vrot.slane %v195_v31, 1 }
  0x3e   :  { %v222_v42 = vmul.f32 %v220_v35, %v220_v35  ;;  %v223_v43 = vmul.f32 %v221_v37, %v221_v37  ;;  %v185_v44 = vadd.f32 %v184_v38, %v183_v28  ;;  %v202_v45 = vrot.slane %v201_v39, 1 }
  0x3f   :  { %v191_v46 = vadd.f32 %v190_v40, %v189_v30  ;;  %v197_v48 = vadd.f32 %v196_v41, %v195_v31 }
  0x40   :  { %v234_v49 = vadd.f32 %v223_v43, %v222_v42  ;;  %v203_v52 = vadd.f32 %v202_v45, %v201_v39 }
  0x41   :  { %v204_v53 = vsub.f32 %v185_v44, %v197_v48 }
  0x42   :  { %235 = vst [vmem:[#allocation7 + $0x3] sm:$0x1] %v234_v49  ;;  %v205_v47 = vsub.f32 %v191_v46, %v203_v52 }
  0x43   :  { %v224_v54 = vmul.f32 0.125, %v204_v53 }
  0x44   :  { %v225_v50 = vmul.f32 0.125, %v205_v47 }
  0x45   :  { %v226_v56 = vmul.f32 %v224_v54, %v224_v54 }
  0x46   :  { %v227_v57 = vmul.f32 %v225_v50, %v225_v50 }
  0x48   :  { %v236_v58 = vadd.f32 %v227_v57, %v226_v56 }
  0x4a   :  { %237 = vst [vmem:[#allocation7 + $0x4] sm:$0x1] %v236_v58 }
  0x4b   :  { %248 = dma.vmem_to_hbm [thread:$0]  %s244_s1, 128, %s246_s21, [#allocation4]  }
  0x4c   :  { %335 = dma.done.wait [#allocation4], 128  }
  0x4d   :  { %336 = vsyncadd [#allocation4], 4294967168 }
  0x4e   :  { %253 = vsyncpa [#allocation3], 1 }
  0x4f   :  { %254 = vsyncpa [#allocation6], 1 }
  0x50   :  { %255 = vsyncpa [#allocation4], 1 }

</bundles_post_ra>
